<compile_context>
chip_gen: v6e
topology: v6e:2x2x1
jax: 0.10.0
libtpu: 0.0.40
codegen_flags: <defaults>
</compile_context>

<pallas_src>
import jax
import jax.numpy as jnp
from jax.experimental import pallas as pl
from jax.experimental.pallas import tpu as pltpu


def synthesizer_attention_kernel(xq_ref, xkv_ref, w1_ref, b1_ref, wv_ref, bv_ref,
                                 w2_ref, b2_ref, wp_ref, bp_ref, o_ref,
                                 acc_ref, vcache_ref):
    q = pl.program_id(1)
    h = pl.program_id(2)

    @pl.when(h == 0)
    def _():
        acc_ref[...] = jnp.zeros_like(acc_ref)

    cd = w1_ref.dtype                    # MXU compute dtype (bf16 or f32)
    xq = xq_ref[0]                       # (tq, C) query rows of this tile
    tq = xq.shape[0]
    T = xkv_ref.shape[1]

    # v_h = x @ Wv_h + bv_h  -- computed once per (batch, head) at the first
    # query tile, cached in VMEM and reused by subsequent query tiles.
    @pl.when(q == 0)
    def _():
        v = jnp.dot(xkv_ref[0], wv_ref[0],
                    preferred_element_type=jnp.float32) + bv_ref[0]
        vcache_ref[h] = v.astype(vcache_ref.dtype)

    # a_h = relu(x_q @ W1_h + b1_h)      (tq, hs), f32 accumulation
    a = jnp.dot(xq, w1_ref[0], preferred_element_type=jnp.float32) + b1_ref[0]
    a = jnp.maximum(a, 0.0)

    # synthesizer scores: a_h @ w2[:, :T] + b2[:T]    (tq, T)
    s = jnp.dot(a.astype(cd), w2_ref[...],
                preferred_element_type=jnp.float32) + b2_ref[...]

    # causal mask: global query row index >= key column index
    q0 = q * tq
    row = q0 + jax.lax.broadcasted_iota(jnp.int32, (tq, T), 0)
    col = jax.lax.broadcasted_iota(jnp.int32, (tq, T), 1)
    s = jnp.where(row >= col, s, jnp.float32(-1e10))

    # softmax over keys (exp + approx reciprocal live on the EUP slot)
    m = jnp.max(s, axis=-1, keepdims=True)
    e = jnp.exp(s - m)
    att = e * pl.reciprocal(jnp.sum(e, axis=-1, keepdims=True), approx=True)

    # y_h = att @ v_h ; accumulate projection: acc += y_h @ Wproj_h
    y = jnp.dot(att.astype(cd), vcache_ref[h],
                preferred_element_type=jnp.float32)
    acc_ref[...] += jnp.dot(y.astype(cd), wp_ref[0],
                            preferred_element_type=jnp.float32)

    @pl.when(h == pl.num_programs(2) - 1)
    def _():
        o_ref[0] = (acc_ref[...] + bp_ref[...]).astype(o_ref.dtype)


def synthesizer_attention(x, params, *, n_head, compute_dtype=jnp.bfloat16, tq=None):
    """x: (B, T, C) float32. params: dict of weights (see init_params)."""
    B, T, C = x.shape
    assert C % n_head == 0, "n_embd must be divisible by n_head"
    hs = C // n_head
    assert params["w2"].shape[1] >= T, "T must be <= block_size - 1"

    if tq is None:
        tq = min(T, 256)
    if T % tq != 0:
        tq = T                       # fall back to a single query tile
    nq = T // tq

    cd = jnp.dtype(compute_dtype)
    xc = x.astype(cd)

    # Pre-reshape weights so the head split is plain DMA addressing.
    w1 = params["w1_w"].T.reshape(C, n_head, hs).transpose(1, 0, 2).astype(cd)   # (nh, C, hs)
    wv = params["value_w"].T.reshape(C, n_head, hs).transpose(1, 0, 2).astype(cd)
    wp = params["proj_w"].T.reshape(n_head, hs, C).astype(cd)                    # (nh, hs, C)
    b1 = params["w1_b"].reshape(n_head, 1, hs).astype(jnp.float32)
    bv = params["value_b"].reshape(n_head, 1, hs).astype(jnp.float32)
    bp = params["proj_b"].reshape(1, C).astype(jnp.float32)
    w2 = params["w2"][:, :T].astype(cd)                                          # (hs, T)
    b2 = params["b2"][:T].reshape(1, T).astype(jnp.float32)

    cost = pl.CostEstimate(
        flops=2 * B * T * C * (3 * C + 2 * T),
        transcendentals=B * n_head * T * T,
        bytes_accessed=int(
            2 * B * T * C * cd.itemsize             # x (query view + value view)
            + B * T * C * x.dtype.itemsize          # output
            + (3 * C * C + hs * T) * cd.itemsize    # weights
            + (3 * C + T) * 4                       # biases (f32)
        ),
    )

    grid_spec = pltpu.PrefetchScalarGridSpec(
        num_scalar_prefetch=0,
        grid=(B, nq, n_head),
        in_specs=[
            pl.BlockSpec((1, tq, C), lambda b, q, h: (b, q, 0)),   # x (query rows)
            pl.BlockSpec((1, T, C), lambda b, q, h: (b, 0, 0)),    # x (full seq, values)
            pl.BlockSpec((1, C, hs), lambda b, q, h: (h, 0, 0)),   # W1_h^T
            pl.BlockSpec((1, 1, hs), lambda b, q, h: (h, 0, 0)),   # b1_h
            pl.BlockSpec((1, C, hs), lambda b, q, h: (h, 0, 0)),   # Wv_h^T
            pl.BlockSpec((1, 1, hs), lambda b, q, h: (h, 0, 0)),   # bv_h
            pl.BlockSpec((hs, T), lambda b, q, h: (0, 0)),         # w2[:, :T]
            pl.BlockSpec((1, T), lambda b, q, h: (0, 0)),          # b2[:T]
            pl.BlockSpec((1, hs, C), lambda b, q, h: (h, 0, 0)),   # Wproj_h^T
            pl.BlockSpec((1, C), lambda b, q, h: (0, 0)),          # bproj
        ],
        out_specs=pl.BlockSpec((1, tq, C), lambda b, q, h: (b, q, 0)),
        scratch_shapes=[
            pltpu.VMEM((tq, C), jnp.float32),        # projection accumulator
            pltpu.VMEM((n_head, T, hs), cd),         # per-batch value cache
        ],
    )

    return pl.pallas_call(
        synthesizer_attention_kernel,
        out_shape=jax.ShapeDtypeStruct((B, T, C), x.dtype),
        grid_spec=grid_spec,
        # q is "arbitrary" because the value cache is written at q==0 and read
        # by later q tiles of the same batch (per-core scratch dependence).
        compiler_params=pltpu.CompilerParams(
            dimension_semantics=("parallel", "arbitrary", "arbitrary")),
        cost_estimate=cost,
    )(xc, xc, w1, b1, wv, bv, w2, b2, wp, bp)


def init_params(key, n_embd, n_head, block_size):
    hs = n_embd // n_head
    ks = jax.random.split(key, 8)
    bound = 1.0 / jnp.sqrt(n_embd)
    u = lambda k, shape, b: jax.random.uniform(k, shape, jnp.float32, -b, b)
    return {
        "w1_w": u(ks[0], (n_embd, n_embd), bound),       # nn.Linear weight (out, in)
        "w1_b": u(ks[1], (n_embd,), bound),
        "value_w": u(ks[2], (n_embd, n_embd), bound),
        "value_b": u(ks[3], (n_embd,), bound),
        "proj_w": u(ks[4], (n_embd, n_embd), bound),
        "proj_b": u(ks[5], (n_embd,), bound),
        "w2": u(ks[6], (hs, block_size - 1), 0.001),     # uniform_(-0.001, 0.001)
        "b2": jnp.zeros((block_size - 1,), jnp.float32),
    }


def reference_forward(x, params, *, n_head, compute_dtype=jnp.float32):
    """Pure-JAX reference of the PyTorch forward (dropout = identity).

    compute_dtype mirrors the kernel's MXU-input casts (f32 accumulation)."""
    B, T, C = x.shape
    hs = C // n_head
    cd = compute_dtype
    xc = x.astype(cd)
    w1 = params["w1_w"].T.astype(cd)
    wv = params["value_w"].T.astype(cd)
    wp = params["proj_w"].T.astype(cd)
    a = jnp.dot(xc, w1, preferred_element_type=jnp.float32) + params["w1_b"]
    a = jnp.maximum(a, 0.0)
    v = jnp.dot(xc, wv, preferred_element_type=jnp.float32) + params["value_b"]
    a = a.reshape(B, T, n_head, hs).transpose(0, 2, 1, 3)       # (B, nh, T, hs)
    v = v.reshape(B, T, n_head, hs).transpose(0, 2, 1, 3)
    att = jnp.einsum("bhts,sk->bhtk", a.astype(cd), params["w2"][:, :T].astype(cd),
                     preferred_element_type=jnp.float32) + params["b2"][:T]
    mask = jnp.tril(jnp.ones((T, T), bool))
    att = jnp.where(mask[None, None], att, -1e10)
    att = jax.nn.softmax(att, axis=-1)
    y = jnp.einsum("bhtk,bhkd->bhtd", att.astype(cd), v.astype(cd),
                   preferred_element_type=jnp.float32)
    y = y.transpose(0, 2, 1, 3).reshape(B, T, C)
    return jnp.dot(y.astype(cd), wp, preferred_element_type=jnp.float32) + params["proj_b"]


if __name__ == "__main__":
    B, T, C = 2, 8, 32
    n_head, block_size = 4, 16

    key = jax.random.PRNGKey(0)
    kx, kp = jax.random.split(key)
    x = jax.random.normal(kx, (B, T, C), jnp.float32)
    params = init_params(kp, C, n_head, block_size)

    # Exact-semantics check (f32 MXU operands). Tolerance is loosened vs a plain
    # divide because the softmax uses the EUP approximate reciprocal.
    out_f32 = jax.block_until_ready(
        synthesizer_attention(x, params, n_head=n_head, compute_dtype=jnp.float32))
    ref_f32 = reference_forward(x, params, n_head=n_head, compute_dtype=jnp.float32)
    assert out_f32.shape == (B, T, C)
    err_f32 = float(jnp.max(jnp.abs(out_f32 - ref_f32)))
    assert jnp.allclose(out_f32, ref_f32, atol=1e-2, rtol=1e-2), err_f32

    # Default fast path: bf16 MXU operands, f32 accumulation (compared against a
    # reference with matching casts).
    out_bf16 = jax.block_until_ready(
        synthesizer_attention(x, params, n_head=n_head))
    ref_bf16 = reference_forward(x, params, n_head=n_head, compute_dtype=jnp.bfloat16)
    err_bf16 = float(jnp.max(jnp.abs(out_bf16 - ref_bf16)))
    assert jnp.allclose(out_bf16, ref_bf16, atol=2e-2, rtol=2e-2), err_bf16

    # Multi-query-tile path (exercises the value cache across q tiles, T % tq == 0).
    out_tiled = jax.block_until_ready(
        synthesizer_attention(x, params, n_head=n_head, compute_dtype=jnp.float32, tq=4))
    err_tiled = float(jnp.max(jnp.abs(out_tiled - ref_f32)))
    assert jnp.allclose(out_tiled, ref_f32, atol=1e-2, rtol=1e-2), err_tiled

    print("KERNEL_OK")
</pallas_src>

<mosaic_0001>
module attributes {stable_mosaic.version = 11 : i64} {
  func.func @synthesizer_attention_kernel(%arg0: i32, %arg1: i32, %arg2: i32, %arg3: memref<1x8x32xf32, #tpu.memory_space<vmem>>, %arg4: memref<1x8x32xf32, #tpu.memory_space<vmem>>, %arg5: memref<1x32x8xf32, #tpu.memory_space<vmem>>, %arg6: memref<1x1x8xf32, #tpu.memory_space<vmem>>, %arg7: memref<1x32x8xf32, #tpu.memory_space<vmem>>, %arg8: memref<1x1x8xf32, #tpu.memory_space<vmem>>, %arg9: memref<8x8xf32, #tpu.memory_space<vmem>>, %arg10: memref<1x8xf32, #tpu.memory_space<vmem>>, %arg11: memref<1x8x32xf32, #tpu.memory_space<vmem>>, %arg12: memref<1x32xf32, #tpu.memory_space<vmem>>, %arg13: memref<1x8x32xf32, #tpu.memory_space<vmem>>, %arg14: memref<8x32xf32, #tpu.memory_space<vmem>>, %arg15: memref<4x8x8xf32, #tpu.memory_space<vmem>>) attributes {dimension_semantics = [#tpu.dimension_semantics<parallel>, #tpu.dimension_semantics<arbitrary>, #tpu.dimension_semantics<arbitrary>], iteration_bounds = array<i64: 2, 1, 4>, scalar_prefetch = 0 : i64, scratch_operands = 2 : i64, tpu.core_type = #tpu.core_type<tc>, window_params = [{transform_indices = @transform_0, window_bounds = array<i64: 1, 8, 32>}, {transform_indices = @transform_1, window_bounds = array<i64: 1, 8, 32>}, {transform_indices = @transform_2, window_bounds = array<i64: 1, 32, 8>}, {transform_indices = @transform_3, window_bounds = array<i64: 1, 1, 8>}, {transform_indices = @transform_4, window_bounds = array<i64: 1, 32, 8>}, {transform_indices = @transform_5, window_bounds = array<i64: 1, 1, 8>}, {pipeline_mode = #tpu.pipeline_mode<synchronous>, transform_indices = @transform_6, window_bounds = array<i64: 8, 8>}, {pipeline_mode = #tpu.pipeline_mode<synchronous>, transform_indices = @transform_7, window_bounds = array<i64: 1, 8>}, {transform_indices = @transform_8, window_bounds = array<i64: 1, 8, 32>}, {pipeline_mode = #tpu.pipeline_mode<synchronous>, transform_indices = @transform_9, window_bounds = array<i64: 1, 32>}, {transform_indices = @transform_10, window_bounds = array<i64: 1, 8, 32>}]} {
    %c0_i32 = arith.constant 0 : i32
    %0 = arith.cmpi eq, %arg2, %c0_i32 : i32
    %1 = arith.extui %0 : i1 to i32
    %c0_i32_0 = arith.constant 0 : i32
    %2 = arith.cmpi ne, %1, %c0_i32_0 : i32
    scf.if %2 {
      %cst_32 = arith.constant 0.000000e+00 : f32
      %53 = vector.broadcast %cst_32 : f32 to vector<8x32xf32>
      %c0_33 = arith.constant 0 : index
      %c0_34 = arith.constant 0 : index
      %54 = vector.load %arg14[%c0_33, %c0_34] : memref<8x32xf32, #tpu.memory_space<vmem>>, vector<8x32xf32>
      tpu.vector_store %arg14[%c0_33, %c0_34], %53 {strides = array<i32>} : memref<8x32xf32, #tpu.memory_space<vmem>>, vector<8x32xf32>,
    } else {
    }
    %c0 = arith.constant 0 : index
    %c0_1 = arith.constant 0 : index
    %c0_2 = arith.constant 0 : index
    %3 = vector.load %arg3[%c0, %c0_1, %c0_2] : memref<1x8x32xf32, #tpu.memory_space<vmem>>, vector<1x8x32xf32>
    %4 = vector.shape_cast %3 : vector<1x8x32xf32> to vector<8x32xf32>
    %c0_i32_3 = arith.constant 0 : i32
    %5 = arith.cmpi eq, %arg1, %c0_i32_3 : i32
    %6 = arith.extui %5 : i1 to i32
    %c0_i32_4 = arith.constant 0 : i32
    %7 = arith.cmpi ne, %6, %c0_i32_4 : i32
    scf.if %7 {
      %c0_32 = arith.constant 0 : index
      %c0_33 = arith.constant 0 : index
      %c0_34 = arith.constant 0 : index
      %53 = vector.load %arg4[%c0_32, %c0_33, %c0_34] : memref<1x8x32xf32, #tpu.memory_space<vmem>>, vector<1x8x32xf32>
      %54 = vector.shape_cast %53 : vector<1x8x32xf32> to vector<8x32xf32>
      %c0_35 = arith.constant 0 : index
      %c0_36 = arith.constant 0 : index
      %c0_37 = arith.constant 0 : index
      %55 = vector.load %arg7[%c0_35, %c0_36, %c0_37] : memref<1x32x8xf32, #tpu.memory_space<vmem>>, vector<1x32x8xf32>
      %56 = vector.shape_cast %55 : vector<1x32x8xf32> to vector<32x8xf32>
      %cst_38 = arith.constant dense<0.000000e+00> : vector<8x8xf32>
      %57 = tpu.matmul %54, %56, %cst_38 {dimension_numbers = #tpu.dot_dimension_numbers<[1], [0], [0], [1], [0, 0, 1, 1], [], []>} : vector<8x32xf32>, vector<32x8xf32>, vector<8x8xf32> -> vector<8x8xf32>
      %c0_39 = arith.constant 0 : index
      %c0_40 = arith.constant 0 : index
      %c0_41 = arith.constant 0 : index
      %58 = vector.load %arg8[%c0_39, %c0_40, %c0_41] : memref<1x1x8xf32, #tpu.memory_space<vmem>>, vector<1x1x8xf32>
      %59 = vector.shape_cast %58 : vector<1x1x8xf32> to vector<1x8xf32>
      %60 = vector.broadcast %59 : vector<1x8xf32> to vector<8x8xf32>
      %61 = arith.addf %57, %60 : vector<8x8xf32>
      %62 = arith.index_cast %arg2 : i32 to index
      %c0_42 = arith.constant 0 : index
      %c0_43 = arith.constant 0 : index
      %63 = vector.load %arg15[%62, %c0_42, %c0_43] : memref<4x8x8xf32, #tpu.memory_space<vmem>>, vector<1x8x8xf32>
      %64 = vector.shape_cast %63 : vector<1x8x8xf32> to vector<8x8xf32>
      %65 = vector.shape_cast %61 : vector<8x8xf32> to vector<1x8x8xf32>
      tpu.vector_store %arg15[%62, %c0_42, %c0_43], %65 {strides = array<i32>} : memref<4x8x8xf32, #tpu.memory_space<vmem>>, vector<1x8x8xf32>,
    } else {
    }
    %c0_5 = arith.constant 0 : index
    %c0_6 = arith.constant 0 : index
    %c0_7 = arith.constant 0 : index
    %8 = vector.load %arg5[%c0_5, %c0_6, %c0_7] : memref<1x32x8xf32, #tpu.memory_space<vmem>>, vector<1x32x8xf32>
    %9 = vector.shape_cast %8 : vector<1x32x8xf32> to vector<32x8xf32>
    %cst = arith.constant dense<0.000000e+00> : vector<8x8xf32>
    %10 = tpu.matmul %4, %9, %cst {dimension_numbers = #tpu.dot_dimension_numbers<[1], [0], [0], [1], [0, 0, 1, 1], [], []>} : vector<8x32xf32>, vector<32x8xf32>, vector<8x8xf32> -> vector<8x8xf32>
    %c0_8 = arith.constant 0 : index
    %c0_9 = arith.constant 0 : index
    %c0_10 = arith.constant 0 : index
    %11 = vector.load %arg6[%c0_8, %c0_9, %c0_10] : memref<1x1x8xf32, #tpu.memory_space<vmem>>, vector<1x1x8xf32>
    %12 = vector.shape_cast %11 : vector<1x1x8xf32> to vector<1x8xf32>
    %13 = vector.broadcast %12 : vector<1x8xf32> to vector<8x8xf32>
    %14 = arith.addf %10, %13 : vector<8x8xf32>
    %cst_11 = arith.constant 0.000000e+00 : f32
    %15 = vector.broadcast %cst_11 : f32 to vector<8x8xf32>
    %16 = arith.maximumf %14, %15 : vector<8x8xf32>
    %c0_12 = arith.constant 0 : index
    %c0_13 = arith.constant 0 : index
    %17 = vector.load %arg9[%c0_12, %c0_13] : memref<8x8xf32, #tpu.memory_space<vmem>>, vector<8x8xf32>
    %cst_14 = arith.constant dense<0.000000e+00> : vector<8x8xf32>
    %18 = tpu.matmul %16, %17, %cst_14 {dimension_numbers = #tpu.dot_dimension_numbers<[1], [0], [0], [1], [0, 0, 1, 1], [], []>} : vector<8x8xf32>, vector<8x8xf32>, vector<8x8xf32> -> vector<8x8xf32>
    %c0_15 = arith.constant 0 : index
    %c0_16 = arith.constant 0 : index
    %19 = vector.load %arg10[%c0_15, %c0_16] : memref<1x8xf32, #tpu.memory_space<vmem>>, vector<1x8xf32>
    %20 = vector.broadcast %19 : vector<1x8xf32> to vector<8x8xf32>
    %21 = arith.addf %18, %20 : vector<8x8xf32>
    %c8_i32 = arith.constant 8 : i32
    %22 = arith.muli %arg1, %c8_i32 : i32
    %23 = tpu.iota {dimensions = array<i32: 0>} : vector<8x8xi32>
    %24 = vector.broadcast %22 : i32 to vector<8x8xi32>
    %25 = arith.addi %24, %23 : vector<8x8xi32>
    %26 = tpu.iota {dimensions = array<i32: 1>} : vector<8x8xi32>
    %27 = arith.cmpi sge, %25, %26 : vector<8x8xi32>
    %cst_17 = arith.constant -1.000000e+10 : f32
    %28 = vector.broadcast %cst_17 : f32 to vector<8x8xf32>
    %29 = arith.select %27, %21, %28 : vector<8x8xi1>, vector<8x8xf32>
    %cst_18 = arith.constant dense<0xFF800000> : vector<8xf32>
    %30 = vector.multi_reduction <maximumf>, %29, %cst_18 [1] : vector<8x8xf32> to vector<8xf32>
    %31 = vector.shape_cast %30 : vector<8xf32> to vector<8x1xf32>
    %32 = vector.broadcast %31 : vector<8x1xf32> to vector<8x8xf32>
    %33 = arith.subf %29, %32 : vector<8x8xf32>
    %34 = math.exp %33 : vector<8x8xf32>
    %cst_19 = arith.constant dense<0.000000e+00> : vector<8xf32>
    %35 = vector.multi_reduction <add>, %34, %cst_19 [1] : vector<8x8xf32> to vector<8xf32>
    %36 = vector.shape_cast %35 : vector<8xf32> to vector<8x1xf32>
    %37 = tpu.reciprocal %36 {approx = true} : vector<8x1xf32> -> vector<8x1xf32>
    %38 = vector.broadcast %37 : vector<8x1xf32> to vector<8x8xf32>
    %39 = arith.mulf %34, %38 : vector<8x8xf32>
    %40 = arith.index_cast %arg2 : i32 to index
    %c0_20 = arith.constant 0 : index
    %c0_21 = arith.constant 0 : index
    %41 = vector.load %arg15[%40, %c0_20, %c0_21] : memref<4x8x8xf32, #tpu.memory_space<vmem>>, vector<1x8x8xf32>
    %42 = vector.shape_cast %41 : vector<1x8x8xf32> to vector<8x8xf32>
    %cst_22 = arith.constant dense<0.000000e+00> : vector<8x8xf32>
    %43 = tpu.matmul %39, %42, %cst_22 {dimension_numbers = #tpu.dot_dimension_numbers<[1], [0], [0], [1], [0, 0, 1, 1], [], []>} : vector<8x8xf32>, vector<8x8xf32>, vector<8x8xf32> -> vector<8x8xf32>
    %c0_23 = arith.constant 0 : index
    %c0_24 = arith.constant 0 : index
    %44 = vector.load %arg14[%c0_23, %c0_24] : memref<8x32xf32, #tpu.memory_space<vmem>>, vector<8x32xf32>
    %c0_25 = arith.constant 0 : index
    %c0_26 = arith.constant 0 : index
    %c0_27 = arith.constant 0 : index
    %45 = vector.load %arg11[%c0_25, %c0_26, %c0_27] : memref<1x8x32xf32, #tpu.memory_space<vmem>>, vector<1x8x32xf32>
    %46 = vector.shape_cast %45 : vector<1x8x32xf32> to vector<8x32xf32>
    %cst_28 = arith.constant dense<0.000000e+00> : vector<8x32xf32>
    %47 = tpu.matmul %43, %46, %cst_28 {dimension_numbers = #tpu.dot_dimension_numbers<[1], [0], [0], [1], [0, 0, 1, 1], [], []>} : vector<8x8xf32>, vector<8x32xf32>, vector<8x32xf32> -> vector<8x32xf32>
    %48 = arith.addf %44, %47 : vector<8x32xf32>
    %c0_29 = arith.constant 0 : index
    %c0_30 = arith.constant 0 : index
    %49 = vector.load %arg14[%c0_29, %c0_30] : memref<8x32xf32, #tpu.memory_space<vmem>>, vector<8x32xf32>
    tpu.vector_store %arg14[%c0_29, %c0_30], %48 {strides = array<i32>} : memref<8x32xf32, #tpu.memory_space<vmem>>, vector<8x32xf32>,
    %c3_i32 = arith.constant 3 : i32
    %50 = arith.cmpi eq, %arg2, %c3_i32 : i32
    %51 = arith.extui %50 : i1 to i32
    %c0_i32_31 = arith.constant 0 : i32
    %52 = arith.cmpi ne, %51, %c0_i32_31 : i32
    scf.if %52 {
      %c0_32 = arith.constant 0 : index
      %c0_33 = arith.constant 0 : index
      %53 = vector.load %arg14[%c0_32, %c0_33] : memref<8x32xf32, #tpu.memory_space<vmem>>, vector<8x32xf32>
      %c0_34 = arith.constant 0 : index
      %c0_35 = arith.constant 0 : index
      %54 = vector.load %arg12[%c0_34, %c0_35] : memref<1x32xf32, #tpu.memory_space<vmem>>, vector<1x32xf32>
      %55 = vector.broadcast %54 : vector<1x32xf32> to vector<8x32xf32>
      %56 = arith.addf %53, %55 : vector<8x32xf32>
      %c0_36 = arith.constant 0 : index
      %c0_37 = arith.constant 0 : index
      %c0_38 = arith.constant 0 : index
      %57 = vector.load %arg13[%c0_36, %c0_37, %c0_38] : memref<1x8x32xf32, #tpu.memory_space<vmem>>, vector<1x8x32xf32>
      %58 = vector.shape_cast %57 : vector<1x8x32xf32> to vector<8x32xf32>
      %59 = vector.shape_cast %56 : vector<8x32xf32> to vector<1x8x32xf32>
      tpu.vector_store %arg13[%c0_36, %c0_37, %c0_38], %59 {strides = array<i32>} : memref<1x8x32xf32, #tpu.memory_space<vmem>>, vector<1x8x32xf32>,
    } else {
    }
    return
  }
  func.func @transform_0(%arg0: i32, %arg1: i32, %arg2: i32) -> (i32, i32, i32) {
    %c0_i32 = arith.constant 0 : i32
    %c0_i32_0 = arith.constant 0 : i32
    return %arg0, %arg1, %c0_i32 : i32, i32, i32
  }
  func.func @transform_1(%arg0: i32, %arg1: i32, %arg2: i32) -> (i32, i32, i32) {
    %c0_i32 = arith.constant 0 : i32
    %c0_i32_0 = arith.constant 0 : i32
    %c0_i32_1 = arith.constant 0 : i32
    return %arg0, %c0_i32, %c0_i32_0 : i32, i32, i32
  }
  func.func @transform_2(%arg0: i32, %arg1: i32, %arg2: i32) -> (i32, i32, i32) {
    %c0_i32 = arith.constant 0 : i32
    %c0_i32_0 = arith.constant 0 : i32
    %c0_i32_1 = arith.constant 0 : i32
    return %arg2, %c0_i32, %c0_i32_0 : i32, i32, i32
  }
  func.func @transform_3(%arg0: i32, %arg1: i32, %arg2: i32) -> (i32, i32, i32) {
    %c0_i32 = arith.constant 0 : i32
    %c0_i32_0 = arith.constant 0 : i32
    %c0_i32_1 = arith.constant 0 : i32
    return %arg2, %c0_i32, %c0_i32_0 : i32, i32, i32
  }
  func.func @transform_4(%arg0: i32, %arg1: i32, %arg2: i32) -> (i32, i32, i32) {
    %c0_i32 = arith.constant 0 : i32
    %c0_i32_0 = arith.constant 0 : i32
    %c0_i32_1 = arith.constant 0 : i32
    return %arg2, %c0_i32, %c0_i32_0 : i32, i32, i32
  }
  func.func @transform_5(%arg0: i32, %arg1: i32, %arg2: i32) -> (i32, i32, i32) {
    %c0_i32 = arith.constant 0 : i32
    %c0_i32_0 = arith.constant 0 : i32
    %c0_i32_1 = arith.constant 0 : i32
    return %arg2, %c0_i32, %c0_i32_0 : i32, i32, i32
  }
  func.func @transform_6(%arg0: i32, %arg1: i32, %arg2: i32) -> (i32, i32) {
    %c0_i32 = arith.constant 0 : i32
    %c0_i32_0 = arith.constant 0 : i32
    %c0_i32_1 = arith.constant 0 : i32
    return %c0_i32, %c0_i32_0 : i32, i32
  }
  func.func @transform_7(%arg0: i32, %arg1: i32, %arg2: i32) -> (i32, i32) {
    %c0_i32 = arith.constant 0 : i32
    %c0_i32_0 = arith.constant 0 : i32
    %c0_i32_1 = arith.constant 0 : i32
    return %c0_i32, %c0_i32_0 : i32, i32
  }
  func.func @transform_8(%arg0: i32, %arg1: i32, %arg2: i32) -> (i32, i32, i32) {
    %c0_i32 = arith.constant 0 : i32
    %c0_i32_0 = arith.constant 0 : i32
    %c0_i32_1 = arith.constant 0 : i32
    return %arg2, %c0_i32, %c0_i32_0 : i32, i32, i32
  }
  func.func @transform_9(%arg0: i32, %arg1: i32, %arg2: i32) -> (i32, i32) {
    %c0_i32 = arith.constant 0 : i32
    %c0_i32_0 = arith.constant 0 : i32
    %c0_i32_1 = arith.constant 0 : i32
    return %c0_i32, %c0_i32_0 : i32, i32
  }
  func.func @transform_10(%arg0: i32, %arg1: i32, %arg2: i32) -> (i32, i32, i32) {
    %c0_i32 = arith.constant 0 : i32
    %c0_i32_0 = arith.constant 0 : i32
    return %arg0, %arg1, %c0_i32 : i32, i32, i32
  }
}

</mosaic_0001>

<bundles_post_ra>
// kernel: tpu_custom_call.1
= control target key start
LH: loop header
LB: loop body
LE: loop exit
PB: predicated region body
PF: predicated region fallthrough
CT: control target
= control target key end

     0   :  { %s1631_s0 = inlined_call_operand.vmem [shape: f32[2,8,32], index: 0, kind: input, shape index: {}]   ;;  %s1632_s1 = inlined_call_operand.vmem [shape: f32[2,8,32], index: 1, kind: input, shape index: {}]   ;;  %s1633_s2 = inlined_call_operand.vmem [shape: f32[4,32,8], index: 2, kind: input, shape index: {}]   ;;  %s1634_s3 = inlined_call_operand.vmem [shape: f32[4,1,8], index: 3, kind: input, shape index: {}]   ;;  %s1635_s4 = inlined_call_operand.vmem [shape: f32[4,32,8], index: 4, kind: input, shape index: {}]   ;;  %s1636_s5 = inlined_call_operand.vmem [shape: f32[4,1,8], index: 5, kind: input, shape index: {}]   ;;  %s1637_s6 = inlined_call_operand.vmem [shape: f32[8,8], index: 6, kind: input, shape index: {}]   ;;  %s1638_s7 = inlined_call_operand.vmem [shape: f32[1,8], index: 7, kind: input, shape index: {}]   ;;  %s1639_s8 = inlined_call_operand.vmem [shape: f32[4,8,32], index: 8, kind: input, shape index: {}]   ;;  %s1640_s9 = inlined_call_operand.vmem [shape: f32[1,32], index: 9, kind: input, shape index: {}]   ;;  %s1641_s10 = inlined_call_operand.hbm [shape: f32[2,8,32], index: 10, kind: output, shape index: {}]  }
   0x1   :  { %1655 = sst [smem:[#allocation18_spill]] %s1631_s0 }
   0x2   :  { %1656 = sst [smem:[#allocation19_spill]] %s1632_s1 }
   0x3   :  { %1657 = sst [smem:[#allocation20_spill]] %s1641_s10 }
   0x4   :  { %15 = vsyncpa [#allocation5], 0 }
   0x5   :  { %17 = vsyncpa [#allocation5 + $0x1], 0  ;;  %s1423_s13 = smov 0   ;;  %s1425_s14 = smov 0  }
   0x6   :  { %s1427_s15 = smov 0   ;;  %s1429_s16 = smov 0  }
   0x7   :  { %s1431_s17 = smov 0   ;;  %s1433_s18 = smov 0  }
   0x8   :  { %s1435_s19 = smov 0   ;;  %s1437_s20 = smov 0  }
   0x9 LB: > { %1658 = sst [smem:[#allocation7_spill]] %s1334_s13  ;;  %s1107_s21 = sadd.s32 4294967295, %s1362_s20   ;;  %s1362_s20 = sphi %s1437_s20, %s23_s20   ;;  %s1358_s19 = sphi %s1435_s19, %s1687_s19   ;;  %s1354_s18 = sphi %s1433_s18, %s1686_s18   ;;  %s1350_s17 = sphi %s1431_s17, %s1685_s17   ;;  %s1346_s16 = sphi %s1429_s16, %s1684_s16   ;;  %s1342_s15 = sphi %s1427_s15, %s1683_s15   ;;  %s1338_s14 = sphi %s1425_s14, %s1682_s14   ;;  %s1334_s13 = sphi %s1423_s13, %s1681_s13  }
   0xa   : > { %1659 = sst [smem:[#allocation8_spill]] %s1338_s14  ;;  %s1108_s22 = sadd.s32 4294967294, %s1362_s20  }
   0xb   : > { %1660 = sst [smem:[#allocation9_spill]] %s1342_s15  ;;  %s35_s23 = sadd.s32 1, %s1354_s18 }
   0xc   : > { %1661 = sst [smem:[#allocation10_spill]] %s1354_s18  ;;  %p36_p0 = scmp.ge.s32.totalorder %s35_s23, 4 }
   0xd   : > { %1662 = sst [smem:[#allocation11_spill]] %s1358_s19  ;;  %s42_s24 = sadd.s32 1, %s1358_s19 }
   0xe   : > { %1663 = sst [smem:[#allocation12_spill]] %s1362_s20  ;;  %p308_p1 = scmp.ne.s32.totalorder %s1342_s15, %s1338_s14 }
   0xf   : > { %p309_p2 = scmp.eq.s32.totalorder %s1107_s21, 7  ;;  %s1689_s23 = smov (%p36_p0, %s35_s23), 0 }
  0x10   : > { %1664 = sst [smem:[#allocation13_spill]] %s1689_s23  ;;  %s1691_s24 = smov (!%p36_p0, %s42_s24), %s1358_s19 }
  0x11   : > { %p1472_p3 = por %p309_p2, %p308_p1  ;;  %p314_p4 = scmp.ne.s32.totalorder %s1338_s14, %s1334_s13 }
  0x12   : > { %p44_p5 = scmp.ge.s32.totalorder %s1691_s24, 2  ;;  %p315_p6 = scmp.eq.s32.totalorder %s1108_s22, 7 }
  0x13   : > { %s1665_s25 = scalar_select %p1472_p3, 1, 0 }
  0x14   : > { %p1111_p7 = scmp.ge.s32.totalorder %s1362_s20, 1  ;;  %p394_p8 = scmp.lt.s32.totalorder %s1362_s20, 9 }
  0x15   : > { %1666 = sst [smem:[#allocation14_spill]] %s1665_s25  ;;  %s1693_s24 = smov (%p44_p5, %s1691_s24), 0 }
  0x16   : > { %1667 = sst [smem:[#allocation15_spill]] %s1693_s24  ;;  %p1482_p9 = por %p315_p6, %p314_p4 }
  0x17   : > { %p395_p10 = pnand %p1111_p7, %p394_p8  ;;  %s293_s27 = ssub.s32 %s1358_s19, %s1693_s24 }
  0x18   : > { %s1668_s26 = scalar_select %p1482_p9, 1, 0 }
  0x19   : > { %s298_s28 = sadd.s32 1, %s1342_s15  ;;  %p296_p11 = scmp.eq.s32.totalorder %s293_s27, 0 }
  0x1a   : > { %1669 = sst [smem:[#allocation16_spill]] %s1668_s26  ;;  %398 = sbr.rel (%p395_p10) target bundleno = 1185 (0x4a1), region = 60 }
  0x1b   : > { %s1490_s29 = scalar_select %p296_p11, %s1342_s15, %s298_s28  }
  0x1c   : > { %s1644_s30 = sand.u32 (!%p395_p10), 1, %s1338_s14   ;;  %p458_p12 = scmp.lt.s32.totalorder (!%p395_p10), %s1350_s17, 1 }
  0x1d   : > { %1670 = sst [smem:[#allocation17_spill]] %s1490_s29  ;;  %s1496_s11 = sshll.u32 (!%p395_p10), %s1644_s30, 3 }
  0x1e   : > { %p469_p13 = scmp.lt.s32.totalorder (!%p395_p10), %s1346_s16, 3  ;;  %s1671_s0 = sld [smem:[#allocation18_spill]] (!%p395_p10) }
  0x1f   : > { %s459_s12 = scalar_select %p458_p12, %s1350_s17, 1 }
  0x20   : > { %s1501_s21 = scalar_select %p469_p13, %s1346_s16, 3 }
  0x21   : > { %s1113_s22 = sshll.u32 %s459_s12, 3  ;;  %s1672_s1 = sld [smem:[#allocation19_spill]] }
  0x22   : > { %s1137_s18 = sshll.u32 %s1501_s21, 5  ;;  %s476_s26 = scalar_lea.vmem %s1634_s3, %s1501_s21 }
  0x23   : > { %s473_s10 = scalar_lea.vmem %s1633_s2, %s1137_s18  ;;  %s1524_s27 = scalar_lea.vmem %s1635_s4, %s1137_s18 }
  0x24   : > { %s1506_s24 = scalar_lea.vmem %s1671_s0, %s1113_s22  ;;  %s484_s19 = scalar_lea.vmem %s1636_s5, %s1501_s21 }
  0x25   : > { %s1119_s23 = sshll.u32 %s1501_s21, 3  ;;  %s457_s15 = scalar_lea.vmem [#allocation4], %s1496_s11 }
  0x26   : > { %s1534_s14 = scalar_lea.vmem %s1639_s8, %s1119_s23  ;;  %p1120_p0 = scmp.ne.s32.totalorder %s1346_s16, 0 }
  0x27   : > { %s1511_s30 = scalar_lea.vmem %s1672_s1, %s1113_s22 }
  0x28   : > { %492 = sbr.rel (%p1120_p0) target bundleno = 47 (0x2f), region = 64 }
  0x2d   : > { %vm493_vm0 = vcmask 261120   ;;  %v1364_v0 = vmov 0.0  }
  0x2e   : > { %494 = vst.msk [vmem:[#allocation2] sm:$0xff] %vm493_vm0, %v1364_v0 }
  0x2f PF: > { %v593_v1 = vld [vmem:[%s473_s10 + $0x18] sm:$0xff]  ;;  %v1365_v2 = vmov 0.0   ;;  %v592_v3 = vld [vmem:[%s473_s10 + $0x10] sm:$0xff]  ;;  %vm1366_vm1 = vmmov 0   ;;  %v591_v6 = vld [vmem:[%s473_s10 + $0x8] sm:$0xff]  ;;  %vm512_vm2 = vcmask 261120   ;;  %v759_v23 = vlaneseq }
  0x30   : > { %1166 = vmatprep.subr.mxu1 %v1365_v2  ;;  %1174 = vmatprep.mubr.msk.f32.mxu1 %vm1366_vm1, %v1365_v2  ;;  %v504_v4 = vld [vmem:[%s1524_s27 + $0x18] sm:$0xff]  ;;  %v503_v5 = vld [vmem:[%s1524_s27 + $0x10] sm:$0xff]  ;;  %v502_v7 = vld [vmem:[%s1524_s27 + $0x8] sm:$0xff]  ;;  %vm588_vm3 = vcmask 64512   ;;  %p1131_p1 = scmp.ne.s32.totalorder %s1346_s16, 3 }
  0x31   : > { %1167 = vmatpush3.msra.mxu1 %v593_v1  ;;  %1155 = vmatprep.subr.mxu0 %v1365_v2  ;;  %v590_v8 = vld [vmem:[%s473_s10] sm:$0xff]  ;;  %v760_v24 = vshrl.u32 %v759_v23, 7  ;;  %v764_v25 = vand.u32 127, %v759_v23 }
  0x32   : > { %1168 = vmatprep.subr.mxu1 %v1365_v2  ;;  %1156 = vmatpush3.msra.mxu0 %v504_v4  ;;  %v495_v9 = vld [vmem:[%s1506_s24] sm:$0xff]  ;;  %s1123_s24 = sshll.u32 %s1346_s16, 3 }
  0x33   : > { %1169 = vmatpush3.msra.mxu1 %v592_v3  ;;  %1157 = vmatprep.subr.mxu0 %v1365_v2  ;;  %v501_v10 = vld [vmem:[%s1524_s27] sm:$0xff]  ;;  %s587_s25 = scalar_lea.vmem [#allocation3], %s1123_s24  ;;  %vm765_vm4 = vcmp.ge.s32.totalorder %v760_v24, %v764_v25 }
  0x34   : > { %1170 = vmatprep.subr.mxu1 %v1365_v2  ;;  %1158 = vmatpush3.msra.mxu0 %v503_v5  ;;  %v500_v11 = vld [vmem:[%s1511_s30] sm:$0xff] }
  0x35   : > { %1171 = vmatpush3.msra.mxu1 %v591_v6  ;;  %1159 = vmatprep.subr.mxu0 %v1365_v2  ;;  %v676_v12 = vld [vmem:[%s1637_s6] sm:$0xff] }
  0x36   : > { %1172 = vmatprep.subr.mxu1 %v1365_v2  ;;  %1160 = vmatpush3.msra.mxu0 %v502_v7  ;;  %v1124_v13 = vld [vmem:[%s476_s26] ss:$0 sm:$0xff] }
  0x37   : > { %1173 = vmatpush3.msra.mxu1 %v590_v8  ;;  %1161 = vmatprep.subr.mxu0 %v1365_v2  ;;  %v1121_v20 = vld [vmem:[%s484_s19] ss:$0 sm:$0xff] }
  0x38   : > { %1175 = vmatmul.mubr.msk.f32.vlgmr.msra.gmra.mxu1 %vm512_vm2, %v495_v9  ;;  %1162 = vmatpush3.msra.mxu0 %v501_v10  ;;  %v1126_v26 = vld [vmem:[%s1638_s7] ss:$0 sm:$0xff] }
  0x39   : > { %1163 = vmatprep.mubr.msk.f32.mxu0 %vm1366_vm1, %v1365_v2  ;;  %1177 = vmatprep.subr.mxu0 %v1365_v2  ;;  %v855_v37 = vld [vmem:[%s1534_s14] sm:$0xff] }
  0x3a   : > { %1164 = vmatmul.mubr.msk.f32.vlgmr.msra.gmra.mxu0 %vm512_vm2, %v500_v11  ;;  %1182 = vmatprep.subr.mxu1 %v1365_v2  ;;  %v854_v43 = vld [vmem:[#allocation2] sm:$0xff] }
  0x3b   : > { %1179 = vmatprep.mubr.msk.f32.mxu0 %vm1366_vm1, %v1365_v2  ;;  %1184 = vmatprep.mubr.msk.f32.mxu1 %vm1366_vm1, %v1365_v2 }
  0x3c   : > { %1178 = vmatpush3.msra.mxu0 %v676_v12 }
  0x3d   : > { %1187 = vmatprep.subr.mxu0 %v1365_v2 }
  0xf8   : > { %v671_v14 = vpop.f32.mrf.mxu1 }
  0xf9   : > { %v672_v15 = vadd.f32 %v1124_v13, %v671_v14 }
  0xfa   : > { %v1176_v16 = vpop.f32.mrf.mxu1  ;;  %v582_v17 = vpop.f32.mrf.mxu0 }
  0xfb   : > { %v675_v18 = vmax.f32 %v672_v15, 0.0  ;;  %v583_v21 = vadd.f32 %v1121_v20, %v582_v17 }
  0xfc   : > { %v1165_v19 = vpop.f32.mrf.mxu0 }
  0xfd   : > { %1180 = vmatmul.mubr.msk.f32.vlgmr.msra.gmra.mxu0 %vm588_vm3, %v675_v18  ;;  %589 = vst.msk [vmem:[%s587_s25] sm:$0xff] %vm588_vm3, %v583_v21 }
  0xfe   : > { %1189 = vmatprep.mubr.msk.f32.mxu0 %vm1366_vm1, %v1365_v2  ;;  %1188 = vmatpush3.msra.mxu0 %v855_v37 }
 0x104   : > { %v780_v22 = vld [vmem:[%s587_s25] sm:$0xff] }
 0x105   : > { %1183 = vmatpush3.msra.mxu1 %v780_v22 }
 0x1bd   : > { %v754_v27 = vpop.f32.mrf.mxu0 }
 0x1be   : > { %v755_v28 = vadd.f32 %v1126_v26, %v754_v27 }
 0x1bf   : > { %v1181_v29 = vpop.f32.mrf.mxu0 }
 0x1c0   : > { %v766_v30 = vsel %vm765_vm4, %v755_v28, -1e+10 }
 0x1c1   : > { %v767_v31 = vsel %vm588_vm3, %v766_v30, -inf }
 0x1c2   : > { %768 = vmax.xlane.f32.xlu0 %v767_v31 }
 0x24b   : > { %v769_v32 = vpop.xlane.xlu0 %768 }
 0x24c   : > { %v770_v33 = vsub.f32 %v766_v30, %v769_v32 }
 0x24e   : > { %v771_v34 = vmul.f32 1.442695, %v770_v33 }
 0x250   : > { %1266 = vpow2.f32 %v771_v34 }
 0x25d   : > { %v1267_v35 = vpop.eup %1266 }
 0x25e   : > { %v773_v36 = vsel %vm588_vm3, %v1267_v35, 0.0 }
 0x25f   : > { %774 = vadd.xlane.f32.xlu0 %v773_v36 }
 0x2e8   : > { %v775_v38 = vpop.xlane.xlu0 %774 }
 0x2e9   : > { %1268 = vrcp.f32 %v775_v38 }
 0x2f6   : > { %v1269_v39 = vpop.eup %1268 }
 0x2f7   : > { %v777_v40 = vmul.f32 %v1269_v39, %v1267_v35 }
 0x2f9   : > { %1185 = vmatmul.mubr.msk.f32.vlgmr.msra.gmra.mxu1 %vm588_vm3, %v777_v40 }
 0x3b9   : > { %v850_v41 = vpop.f32.mrf.mxu1 }
 0x3ba   : > { %1190 = vmatmul.mubr.msk.f32.vlgmr.msra.gmra.mxu0 %vm588_vm3, %v850_v41 }
 0x3bb   : > { %v1186_v42 = vpop.f32.mrf.mxu1 }
 0x479   : > { %934 = sbr.rel (%p1131_p1) target bundleno = 1160 (0x488), region = 72 }
 0x47a   : > { %v925_v44 = vpop.f32.mrf.mxu0 }
 0x47b   : > { %v929_v45 = vadd.f32 %v925_v44, %v854_v43 }
 0x47c   : > { %v1191_v46 = vpop.f32.mrf.mxu0 }
 0x47d   : > { %930 = vst.msk [vmem:[#allocation2] sm:$0xff] %vm512_vm2, %v929_v45 }
 0x47e   : > { %v1132_v48 = vld [vmem:[%s1640_s9] ss:$0 sm:$0xff] }
 0x484   : > { %v935_v47 = vld [vmem:[#allocation2] sm:$0xff] }
 0x485   : > { %v943_v49 = vadd.f32 %v1132_v48, %v935_v47 }
 0x487   : > { %944 = vst.msk [vmem:[%s457_s15] sm:$0xff] %vm512_vm2, %v943_v49 }
 0x488 PF: > { %s1673_s21 = sld [smem:[#allocation8_spill]]  ;;  %s1134_s27 = sshll.u32 %s1350_s17, 7 }
 0x489   : > { %s1675_s16 = sld [smem:[#allocation20_spill]]  ;;  %s960_s0 = sshll.u32 %s457_s15, 4  ;;  %s961_s0 = int_to_ptr.vmem [resolvable:$true] %s960_s0 }
 0x48a   : > { %s1270_s13 = scalar_lea.vmem %s961_s0, 128  ;;  %s1367_s18 = smov [#allocation4]  }
 0x48b   : > { %p1271_p2 = scmp.ne.s32.totalorder %s961_s0, %s1270_s13  ;;  %s1274_s20 = sshll.u32 %s1367_s18, 4  ;;  %s1275_s20 = int_to_ptr.vmem [resolvable:$false] %s1274_s20 }
 0x48c   : > { %s1276_s24 = scalar_lea.vmem %s1275_s20, 256  ;;  %p1277_p6 = scmp.lt.s32.totalorder %s961_s0, %s1275_s20 }
 0x48d   : > { %p1272_p4 = pnand %p1271_p2, %p1472_p3  ;;  %p1278_p7 = scmp.lt.s32.totalorder %s1276_s24, %s1270_s13 }
 0x48e   : > { %s1677_s1 = sand.u32 1, %s1673_s21  }
 0x48f   : > { %s1676_s23 = smov %s1675_s16  ;;  %s958_s22 = scalar_lea.hbm %s1675_s16, %s1134_s27 }
 0x490   : > { %s946_s10 = scalar_lea.sflag [#allocation5], %s1677_s1  ;;  %p1273_p5 = pneg %p1272_p4 }
 0x491   : > { %p1279_p8 = por %p1278_p7, %p1277_p6 }
 0x493   : > { %p1280_p10 = pnand %p1279_p8, %p1273_p5 }
 0x495   : > { %1283 = shalt.err (!%p1280_p10)
}
 0x496   : > { %s1284_s17 = scalar_lea.hbm %s958_s22, 128  ;;  %s1288_s25 = scalar_lea.hbm %s1676_s23, 256 }
 0x497   : > { %p1285_p11 = scmp.ne.s32.totalorder %s958_s22, %s1284_s17  ;;  %p1289_p0 = scmp.lt.s32.totalorder %s958_s22, %s1676_s23 }
 0x498   : > { %p1290_p1 = scmp.lt.s32.totalorder %s1288_s25, %s1284_s17 }
 0x499   : > { %p1286_p12 = pnand %p1285_p11, %p1472_p3 }
 0x49a   : > { %p1291_p2 = por %p1290_p1, %p1289_p0 }
 0x49b   : > { %p1287_p13 = pneg %p1286_p12 }
 0x49d   : > { %p1292_p4 = pnand %p1291_p2, %p1287_p13 }
 0x49f   : > { %1295 = shalt.err (!%p1292_p4)
}
 0x4a0   : > { %1192 = dma.vmem_to_hbm [thread:$0]  (%p1472_p3), %s961_s0, 128, %s958_s22, %s946_s10  }
 0x4a1 PF: > { %s1678_s14 = sld [smem:[#allocation12_spill]] }
 0x4a2   : > { %s1679_s30 = sld [smem:[#allocation7_spill]] }
 0x4a7   : > { %p1198_p5 = scmp.ge.s32.totalorder %s1678_s14, 2 }
 0x4a8   : > { %s972_s27 = sand.u32 1, %s1679_s30  }
 0x4a9   : > { %p1195_p6 = pnand %p1198_p5, %p1482_p9  ;;  %s973_s28 = scalar_lea.sflag [#allocation5], %s972_s27 }
 0x4ab   : > { %p1196_p7 = pneg %p1195_p6 }
 0x4ad   : > { %1329 = dma.done.wait (%p1196_p7), %s973_s28, 128  }
 0x4ae   : > { %1331 = vsyncadd (%p1196_p7), %s973_s28, 4294967168  ;;  %s23_s20 = sadd.s32 1, %s1678_s14   ;;  %s1681_s13 = sld [smem:[#allocation8_spill]] }
 0x4af   : > { %p20_p8 = scmp.ge.s32.totalorder %s23_s20, 10   ;;  %s1682_s14 = sld [smem:[#allocation9_spill]] }
 0x4b0   : > { %s1683_s15 = sld [smem:[#allocation17_spill]] }
 0x4b1   : > { %s1684_s16 = sld [smem:[#allocation10_spill]]  ;;  %22 = sbr.rel (!%p20_p8) target bundleno = 9 (0x9), region = 127 }
 0x4b2   : > { %s1685_s17 = sld [smem:[#allocation11_spill]] }
 0x4b3   : > { %s1686_s18 = sld [smem:[#allocation13_spill]] }
 0x4b4   : > { %s1687_s19 = sld [smem:[#allocation15_spill]] }
 0x4b6   :  { %978 = vsyncpa [#allocation5], 1 }
 0x4b7   :  { %980 = vsyncpa [#allocation5 + $0x1], 1 }

</bundles_post_ra>
